<compile_context>
chip_gen: v5e
topology: v5e:2x2
jax: 0.10.0
libtpu: 0.0.40
codegen_flags: <defaults>
</compile_context>

<pallas_src>
import functools

import jax
import jax.numpy as jnp
from jax.experimental import pallas as pl
from jax.experimental.pallas import tpu as pltpu


_LANE_WIDTHS = (2048, 1024, 512, 256, 128)   # lane-dense candidate column widths
_DEFAULT_TILE_BYTES = 2 * 1024 * 1024        # ~roofline-saturating tile; low VMEM pressure
_NSPLIT = 2                                  # pass-1 reduction split across up to 2 TCs (v7x)


def _cdiv(a, b):
    return -(-a // b)


def _vmem_capacity_bytes():
    try:
        return int(pltpu.get_tpu_info().vmem_capacity_bytes)
    except Exception:
        return 64 * 1024 * 1024   # v7x physical VMEM; safe lower bound on all generations


def _plan_layout(n):
    """Lane-dense 2D view (cols, rows) of the flattened input.

    rows*cols == n whenever n % 128 == 0 (no padding); otherwise rows*cols - n < 128."""
    if n % 128 == 0:
        for c in _LANE_WIDTHS:
            if n % c == 0 and n // c >= 8:
                return c, n // c
        return 128, n // 128
    return 128, _cdiv(n, 128)


def _plan_tiles(rows, cols, itemsize, tile_bytes_cap):
    """Row-tile size for the streaming path.

    Multiple of 8 (or the full row count), <= tile_bytes_cap per tile, preferring an
    exact divisor of `rows` so no row padding (= no extra whole-array HBM copy) is
    needed.  Returns (tile_rows, grid_rows)."""
    bytes_per_row = cols * itemsize
    cap_rows = max(8, (tile_bytes_cap // bytes_per_row) // 8 * 8)
    if rows <= cap_rows:
        return rows, 1                       # single block == full first dim (always legal)
    if rows % 8 == 0:
        floor = max(8, cap_rows // 8)        # don't accept tiles >8x smaller than the cap
        for tr in range(cap_rows, floor - 1, -8):
            if rows % tr == 0:
                return tr, rows // tr        # exact tiling: no pad, no output slice
    # Rare: no suitable divisor -> caller pads rows up to grid_rows*tile_rows.
    return cap_rows, _cdiv(rows, cap_rows)


# ----------------------------- kernels -----------------------------

def _fused_centered_kernel(x_ref, o_ref, *, inv_n):
    """Whole lane-dense array resident in VMEM: global mean + subtract in one shot.

    Padding elements (if any) are zero, so they do not perturb the sum: we scale by
    1/true_n and slice the padded tail off outside."""
    x = x_ref[...].astype(jnp.float32)
    mean = jnp.sum(x) * inv_n
    o_ref[...] = (x - mean).astype(o_ref.dtype)


def _sum_kernel(x_ref, part_ref, acc_ref, *, inner, grid_rows):
    """Pass 1: streaming global sum.

    Grid = (NSPLIT, inner).  The leading 'parallel' axis shards the reduction across
    both TensorCores on v7x (a no-op on single-TC v5e/v6e).  Accumulation happens in
    an (8,128) f32 VMEM scratch (plain full-tile ops, no per-step sub-lane stores);
    each core writes its own (8,128) partial-sum block once, at its last step.
    Steps past grid_rows (only when grid_rows is odd) are gated off."""
    c = pl.program_id(0)
    i = pl.program_id(1)

    @pl.when(i == 0)
    def _init():
        acc_ref[...] = jnp.zeros_like(acc_ref)

    @pl.when(c * inner + i < grid_rows)
    def _accumulate():
        acc_ref[...] += jnp.sum(x_ref[...].astype(jnp.float32))

    @pl.when(i == inner - 1)
    def _finalize():
        part_ref[...] = acc_ref[...]


def _subtract_kernel(mean_ref, x_ref, o_ref):
    """Pass 2: row-tiled X - mean; mean is a (1,) f32 scalar living in SMEM."""
    mean = mean_ref[0]
    o_ref[...] = (x_ref[...].astype(jnp.float32) - mean).astype(o_ref.dtype)


# ----------------------------- wrapper -----------------------------

@functools.partial(jax.jit, static_argnames=("max_block_bytes",))
def centered_layer(x, *, max_block_bytes=None):
    """X - X.mean(); same semantics as the PyTorch CenteredLayer forward.

    max_block_bytes: optional per-tile byte budget override; also forces the
    two-pass streaming path (used by tests to exercise it on small arrays).
    """
    # TODO(synk): integer dtypes — torch.mean rejects int tensors; here the mean is
    # computed in f32 and the result cast back (truncates) rather than erroring.
    orig_shape = x.shape
    out_dtype = x.dtype
    n = int(x.size)
    if n == 0:
        return x
    itemsize = jnp.dtype(x.dtype).itemsize

    vmem_cap = _vmem_capacity_bytes()
    # Scoped VMEM limit: ~3/4 of physical, capped at 100 MiB (96 MiB v5e/v6e, 48 MiB v7x).
    vmem_limit = int(min(vmem_cap * 3 // 4, 100 * 1024 * 1024))

    force_tiled = max_block_bytes is not None
    tile_cap = int(max_block_bytes) if force_tiled else _DEFAULT_TILE_BYTES

    cols, rows = _plan_layout(n)
    flat = x.reshape(-1)

    # ---- fused single-read path: whole array VMEM-resident, 2N HBM bytes ----
    # Budget: in block + out block + f32 temps (conservative) + slack must fit the
    # scoped VMEM limit.  ~19 MiB f32 input on v5e/v6e, ~9 MiB on v7x.
    fused_need = rows * cols * (3 * itemsize + 8) + (2 << 20)
    if not force_tiled and fused_need <= vmem_limit:
        padded_n = rows * cols
        if padded_n != n:                    # < 128 pad elements; only for ragged sizes
            flat = jnp.pad(flat, (0, padded_n - n))
        x2 = flat.reshape(rows, cols)
        out2 = pl.pallas_call(
            functools.partial(_fused_centered_kernel, inv_n=1.0 / n),
            out_shape=jax.ShapeDtypeStruct((rows, cols), out_dtype),
            grid=(),
            in_specs=[pl.BlockSpec((rows, cols), lambda: (0, 0))],
            out_specs=pl.BlockSpec((rows, cols), lambda: (0, 0)),
            compiler_params=pltpu.CompilerParams(vmem_limit_bytes=vmem_limit),
        )(x2)
        out_flat = out2.reshape(-1)
        if padded_n != n:
            out_flat = out_flat[:n]
        return out_flat.reshape(orig_shape)

    # ---- two-pass streaming path (sum, then subtract), 3N HBM bytes ----
    tile_rows, grid_rows = _plan_tiles(rows, cols, itemsize, tile_cap)
    padded_rows = tile_rows * grid_rows
    padded_n = padded_rows * cols
    if padded_n != n:
        # TODO(synk): rare path (n not lane/tile-friendly): the pad + trailing slice cost
        # one extra HBM copy each; could be removed with in-kernel ragged-tail masking.
        flat = jnp.pad(flat, (0, padded_n - n))   # zero pad: harmless for the sum
    x2 = flat.reshape(padded_rows, cols)

    row_spec = pl.BlockSpec((tile_rows, cols), lambda i: (i, 0))

    # Pass 1: global sum, reduction split across up to 2 TensorCores (v7x).
    inner = _cdiv(grid_rows, _NSPLIT)

    def _sum_in_map(c, i):
        # Clamp so the (at most one) overhang step of an odd grid re-reads a valid
        # block; its contribution is gated off inside the kernel.
        return (jnp.minimum(c * inner + i, grid_rows - 1), 0)

    partials = pl.pallas_call(
        functools.partial(_sum_kernel, inner=inner, grid_rows=grid_rows),
        out_shape=jax.ShapeDtypeStruct((_NSPLIT * 8, 128), jnp.float32),
        grid=(_NSPLIT, inner),
        in_specs=[pl.BlockSpec((tile_rows, cols), _sum_in_map)],
        out_specs=pl.BlockSpec((8, 128), lambda c, i: (c, 0)),
        scratch_shapes=[pltpu.VMEM((8, 128), jnp.float32)],
        compiler_params=pltpu.CompilerParams(
            dimension_semantics=("parallel", "arbitrary"),
            vmem_limit_bytes=vmem_limit),
        cost_estimate=pl.CostEstimate(
            flops=padded_n, transcendentals=0,
            bytes_accessed=padded_n * itemsize),
    )(x2)

    # Combine the per-core partials; mean over the TRUE element count, kept in f32.
    total = partials[0, 0]
    for c in range(1, _NSPLIT):
        total = total + partials[8 * c, 0]
    mean = jnp.reshape(total * (1.0 / n), (1,)).astype(jnp.float32)

    # Pass 2: tiled subtract; mean as SMEM scalar; "parallel" -> both TCs on v7x.
    out2 = pl.pallas_call(
        _subtract_kernel,
        out_shape=jax.ShapeDtypeStruct((padded_rows, cols), out_dtype),
        grid=(grid_rows,),
        in_specs=[pl.BlockSpec(memory_space=pltpu.MemorySpace.SMEM), row_spec],
        out_specs=row_spec,
        compiler_params=pltpu.CompilerParams(
            dimension_semantics=("parallel",),
            vmem_limit_bytes=vmem_limit),
        cost_estimate=pl.CostEstimate(
            flops=padded_n, transcendentals=0,
            bytes_accessed=2 * padded_n * itemsize),
    )(mean, x2)

    out_flat = out2.reshape(-1)
    if padded_n != n:
        out_flat = out_flat[:n]
    return out_flat.reshape(orig_shape)


if __name__ == "__main__":
    key = jax.random.PRNGKey(0)
    k0, k1, k2 = jax.random.split(key, 3)

    # 1) Small input (fused single-read path); shape consistent with the module's forward.
    x = jax.random.normal(k0, (2, 4, 16, 16), dtype=jnp.float32)
    y = jax.block_until_ready(centered_layer(x))
    y_ref = x - jnp.mean(x)
    assert y.shape == x.shape and y.dtype == x.dtype
    assert jnp.allclose(y, y_ref, atol=1e-5, rtol=1e-5)
    assert abs(float(jnp.mean(y))) < 1e-5

    # 2) Exercise the two-pass streaming path (2-way split reduction + parallel subtract)
    #    on a small array by forcing tiled mode with a tiny per-tile budget.
    x2 = jax.random.normal(k1, (64, 512), dtype=jnp.float32)
    y2 = jax.block_until_ready(centered_layer(x2, max_block_bytes=64 * 1024))
    assert jnp.allclose(y2, x2 - jnp.mean(x2), atol=1e-5, rtol=1e-5)

    # 3) Awkward (non-multiple-of-128) size -> padded lane-dense layout, multi-tile grid.
    x3 = jax.random.normal(k2, (7, 300), dtype=jnp.float32)
    y3 = jax.block_until_ready(centered_layer(x3, max_block_bytes=8 * 1024))
    assert jnp.allclose(y3, x3 - jnp.mean(x3), atol=1e-5, rtol=1e-5)

    print("KERNEL_OK")
</pallas_src>

<mosaic_0001>
module attributes {stable_mosaic.version = 11 : i64} {
  func.func @_fused_centered_kernel(%arg0: memref<8x256xf32, #tpu.memory_space<vmem>>, %arg1: memref<8x256xf32, #tpu.memory_space<vmem>>) attributes {dimension_semantics = [], scalar_prefetch = 0 : i64, scratch_operands = 0 : i64, tpu.core_type = #tpu.core_type<tc>} {
    %c0 = arith.constant 0 : index
    %c0_0 = arith.constant 0 : index
    %0 = vector.load %arg0[%c0, %c0_0] : memref<8x256xf32, #tpu.memory_space<vmem>>, vector<8x256xf32>
    %1 = vector.shape_cast %0 : vector<8x256xf32> to vector<1x8x256xf32>
    %cst = arith.constant dense<0.000000e+00> : vector<1xf32>
    %2 = vector.multi_reduction <add>, %1, %cst [1, 2] : vector<1x8x256xf32> to vector<1xf32>
    %3 = vector.shape_cast %2 : vector<1xf32> to vector<1x1x1xf32>
    %4 = vector.extract %3[0, 0, 0] : f32 from vector<1x1x1xf32>
    %cst_1 = arith.constant 4.8828125E-4 : f32
    %5 = arith.mulf %4, %cst_1 : f32
    %6 = vector.broadcast %5 : f32 to vector<8x256xf32>
    %7 = arith.subf %0, %6 : vector<8x256xf32>
    %c0_2 = arith.constant 0 : index
    %c0_3 = arith.constant 0 : index
    %8 = vector.load %arg1[%c0_2, %c0_3] : memref<8x256xf32, #tpu.memory_space<vmem>>, vector<8x256xf32>
    tpu.vector_store %arg1[%c0_2, %c0_3], %7 {strides = array<i32>} : memref<8x256xf32, #tpu.memory_space<vmem>>, vector<8x256xf32>,
    return
  }
}

</mosaic_0001>

<bundles_post_ra>
// kernel: centered_layer.1
= control target key start
LH: loop header
LB: loop body
LE: loop exit
PB: predicated region body
PF: predicated region fallthrough
CT: control target
= control target key end

     0   :  { %s54_s0 = inlined_call_operand.vmem [shape: f32[8,256], index: 0, kind: input, shape index: {}]   ;;  %s55_s1 = inlined_call_operand.vmem [shape: f32[8,256], index: 1, kind: output, shape index: {}]  }
   0x1   :  { %v8_v0 = vld [vmem:[%s54_s0] sm:$0xff]  ;;  %v9_v1 = vld [vmem:[%s54_s0 + $0x8] sm:$0xff] }
   0x2   :  { %v10_v2 = vadd.f32 %v9_v1, %v8_v0 }
   0x4   :  { %11 = vadd.xlane.f32.xlu0 %v10_v2 }
  0x77   :  { %v12_v3 = vpop.xlane.xlu0 %11 }
  0x78   :  { %v13_v4 = vrot.slane %v12_v3, 4 }
  0x7a   :  { %v14_v5 = vadd.f32 %v13_v4, %v12_v3 }
  0x7c   :  { %v15_v6 = vrot.slane %v14_v5, 2 }
  0x7e   :  { %v16_v7 = vadd.f32 %v15_v6, %v14_v5 }
  0x80   :  { %v17_v8 = vrot.slane %v16_v7, 1 }
  0x82   :  { %v18_v9 = vadd.f32 %v17_v8, %v16_v7 }
  0x84   :  { %30 = vpush %v18_v9 }
  0xb5   :  { %s31_s10 = spop %30 }
  0xb6   :  { %s20_s11 = smul.f32 0.00048828125, %s31_s10 }
  0xb8   :  { %v21_v10 = vstv %s20_s11 }
  0xb9   :  { %v22_v11 = vsub.f32 %v8_v0, %v21_v10  ;;  %v23_v12 = vsub.f32 %v9_v1, %v21_v10 }
  0xbb   :  { %24 = vst [vmem:[%s55_s1] sm:$0xff] %v22_v11 }
  0xbc   :  { %25 = vst [vmem:[%s55_s1 + $0x8] sm:$0xff] %v23_v12 }

</bundles_post_ra>
